<compile_context>
chip_gen: v7x
topology: tpu7x:2x2x1
jax: 0.10.0
libtpu: 0.0.40
codegen_flags: <defaults>
</compile_context>

<pallas_src>
import functools
import math

import jax
import jax.numpy as jnp
from jax import lax
from jax.experimental import pallas as pl
from jax.experimental.pallas import tpu as pltpu  # noqa: F401  (hardware namespace, kept for tiled variant)


# ---------------------------------------------------------------------------
# Fused layer body (traced inside the kernel, everything resident in VMEM)
# ---------------------------------------------------------------------------
def _conv_bn_lrelu(x, adj_mask, w, b, gamma, beta, *, heads, out_ch, eps, slope):
    """TransformerConv (concat, root_weight) fused with BatchNorm1d + LeakyReLU."""
    hc = heads * out_ch
    neg_big = jnp.float32(-1e30)
    inv_sqrt_c = jnp.float32(1.0 / math.sqrt(out_ch))

    # -- fused projection: one MXU matmul computes q | k | v | skip ----------
    proj = jnp.dot(x.astype(jnp.bfloat16), w, preferred_element_type=jnp.float32) + b
    q = proj[:, 0 * hc:1 * hc] * inv_sqrt_c      # fold 1/sqrt(C) into q (cheap [N,HC] mul)
    k = proj[:, 1 * hc:2 * hc]
    v = proj[:, 2 * hc:3 * hc]
    skip = proj[:, 3 * hc:4 * hc]

    q_bf = q.astype(jnp.bfloat16)
    k_bf = k.astype(jnp.bfloat16)
    v_bf = v.astype(jnp.bfloat16)

    # -- per-head masked attention (static loop, heads is small) -------------
    heads_out = []
    for h in range(heads):
        qh = q_bf[:, h * out_ch:(h + 1) * out_ch]     # [N, C]
        kh = k_bf[:, h * out_ch:(h + 1) * out_ch]     # [N, C]
        vh = v_bf[:, h * out_ch:(h + 1) * out_ch]     # [N, C]

        # scores[i, j] = (q_i / sqrt(C)) . k_j  — contract on C, no explicit k transpose
        scores = lax.dot_general(qh, kh, (((1,), (1,)), ((), ())),
                                 preferred_element_type=jnp.float32)     # [N, N]
        s_masked = jnp.where(adj_mask, scores, neg_big)                  # single [N,N] select
        row_max = jnp.max(s_masked, axis=-1, keepdims=True)              # [N, 1]
        p = jnp.exp(s_masked - row_max)                                  # masked entries underflow to 0
        denom = jnp.sum(p, axis=-1, keepdims=True)                       # [N, 1]
        # rows with no incoming edges contribute nothing (guard is only [N,1] wide)
        inv = jnp.where(row_max > jnp.float32(-1e29),
                        pl.reciprocal(denom, approx=True),
                        jnp.float32(0.0))
        alpha = p * inv                                                  # [N, N]

        heads_out.append(jnp.dot(alpha.astype(jnp.bfloat16), vh,
                                 preferred_element_type=jnp.float32))    # [N, C]

    out = jnp.concatenate(heads_out, axis=-1) + skip                     # [N, H*C], full width

    # -- fused BatchNorm1d (training-mode batch stats, biased var) + LeakyReLU
    mean = jnp.mean(out, axis=0, keepdims=True)                          # [1, H*C]
    mean_sq = jnp.mean(out * out, axis=0, keepdims=True)                 # one-pass stats
    var = jnp.maximum(mean_sq - mean * mean, 0.0)
    scale = gamma * lax.rsqrt(var + eps)                                 # fold gamma into scale
    z = (out - mean) * scale + beta
    return jnp.where(z > 0, z, slope * z)


# ---------------------------------------------------------------------------
# Pallas kernel: whole GraphFormer forward in one call
# ---------------------------------------------------------------------------
def _graphformer_kernel(x_ref, adj_ref,
                        w1_ref, b1_ref, g1_ref, be1_ref,
                        w2_ref, b2_ref, g2_ref, be2_ref,
                        o_ref, *, heads, hidden_dim, embedding_dim, eps, slope):
    adj_mask = adj_ref[...].astype(jnp.int32) != 0                       # int8 mask -> bool [N, N]

    h = _conv_bn_lrelu(x_ref[...], adj_mask,
                       w1_ref[...], b1_ref[...], g1_ref[...], be1_ref[...],
                       heads=heads, out_ch=hidden_dim, eps=eps, slope=slope)
    h = _conv_bn_lrelu(h, adj_mask,
                       w2_ref[...], b2_ref[...], g2_ref[...], be2_ref[...],
                       heads=heads, out_ch=embedding_dim, eps=eps, slope=slope)

    o_ref[...] = h.astype(o_ref.dtype)                                   # single full-width store


# ---------------------------------------------------------------------------
# Wrapper (glue)
# ---------------------------------------------------------------------------
def graphformer_forward(x, adj_i8, params, *, num_head, hidden_dim, embedding_dim,
                        eps=1e-5, slope=0.1):
    n = x.shape[0]

    def fuse(wq, bq, wk, bk, wv, bv, ws, bs):
        # concatenate q|k|v|skip weights into one [Din, 4*H*C] bf16 matrix + one f32 bias row
        w = jnp.concatenate([wq, wk, wv, ws], axis=1).astype(jnp.bfloat16)
        b = jnp.concatenate([bq, bk, bv, bs], axis=0).reshape(1, -1).astype(jnp.float32)
        return w, b

    w1, b1 = fuse(*params["conv_first"])
    w2, b2 = fuse(*params["conv_last"])
    g1, be1 = params["bn_first"]
    g2, be2 = params["bn_last"]

    kernel = functools.partial(_graphformer_kernel, heads=num_head,
                               hidden_dim=hidden_dim, embedding_dim=embedding_dim,
                               eps=eps, slope=slope)
    return pl.pallas_call(
        kernel,
        out_shape=jax.ShapeDtypeStruct((n, num_head * embedding_dim), jnp.float32),
    )(x, adj_i8,
      w1, b1, g1.reshape(1, -1), be1.reshape(1, -1),
      w2, b2, g2.reshape(1, -1), be2.reshape(1, -1))


def make_params(key, input_dim, hidden_dim, embedding_dim, num_head):
    def linear(key, din, dout, scale=0.1):
        kw, kb = jax.random.split(key)
        w = scale * jax.random.normal(kw, (din, dout), jnp.float32)
        b = scale * jax.random.normal(kb, (dout,), jnp.float32)
        return w, b

    keys = jax.random.split(key, 8)
    hc = hidden_dim * num_head
    ec = embedding_dim * num_head

    wq1, bq1 = linear(keys[0], input_dim, hc)
    wk1, bk1 = linear(keys[1], input_dim, hc)
    wv1, bv1 = linear(keys[2], input_dim, hc)
    ws1, bs1 = linear(keys[3], input_dim, hc)

    wq2, bq2 = linear(keys[4], hc, ec)
    wk2, bk2 = linear(keys[5], hc, ec)
    wv2, bv2 = linear(keys[6], hc, ec)
    ws2, bs2 = linear(keys[7], hc, ec)

    return {
        "conv_first": (wq1, bq1, wk1, bk1, wv1, bv1, ws1, bs1),
        "bn_first": (jnp.ones((hc,), jnp.float32), jnp.zeros((hc,), jnp.float32)),
        "conv_last": (wq2, bq2, wk2, bk2, wv2, bv2, ws2, bs2),
        "bn_last": (jnp.ones((ec,), jnp.float32), jnp.zeros((ec,), jnp.float32)),
    }


def edge_index_to_adj(edge_index, num_nodes):
    """Dense int8 mask: adj[i, j] = 1 iff there is an edge j -> i (PyG source->target)."""
    src, dst = edge_index
    adj = jnp.zeros((num_nodes, num_nodes), jnp.int8)
    return adj.at[dst, src].set(1)


if __name__ == "__main__":
    key = jax.random.PRNGKey(0)

    # Small shapes consistent with the module.
    num_nodes = 8
    input_dim = 16
    hidden_dim = 8
    embedding_dim = 8
    num_head = 2

    k_x, k_p = jax.random.split(key)
    x = jax.random.normal(k_x, (num_nodes, input_dim), jnp.float32)

    # Ring graph with self loops (every node has at least one incoming edge).
    nodes = jnp.arange(num_nodes)
    src = jnp.concatenate([nodes, nodes])
    dst = jnp.concatenate([(nodes + 1) % num_nodes, nodes])
    edge_index = jnp.stack([src, dst], axis=0)          # [2, E]
    adj = edge_index_to_adj(edge_index, num_nodes)      # int8 [N, N]

    params = make_params(k_p, input_dim, hidden_dim, embedding_dim, num_head)

    out = graphformer_forward(
        x, adj, params,
        num_head=num_head, hidden_dim=hidden_dim, embedding_dim=embedding_dim,
    )
    out = jax.block_until_ready(out)
    assert out.shape == (num_nodes, embedding_dim * num_head)
    assert bool(jnp.all(jnp.isfinite(out)))
    print("KERNEL_OK")
</pallas_src>

<mosaic_0001>
module attributes {stable_mosaic.version = 11 : i64} {
  func.func @_graphformer_kernel(%arg0: memref<8x16xf32, #tpu.memory_space<vmem>>, %arg1: memref<8x8xi8, #tpu.memory_space<vmem>>, %arg2: memref<16x64xbf16, #tpu.memory_space<vmem>>, %arg3: memref<1x64xf32, #tpu.memory_space<vmem>>, %arg4: memref<1x16xf32, #tpu.memory_space<vmem>>, %arg5: memref<1x16xf32, #tpu.memory_space<vmem>>, %arg6: memref<16x64xbf16, #tpu.memory_space<vmem>>, %arg7: memref<1x64xf32, #tpu.memory_space<vmem>>, %arg8: memref<1x16xf32, #tpu.memory_space<vmem>>, %arg9: memref<1x16xf32, #tpu.memory_space<vmem>>, %arg10: memref<8x16xf32, #tpu.memory_space<vmem>>) attributes {dimension_semantics = [], scalar_prefetch = 0 : i64, scratch_operands = 0 : i64, tpu.core_type = #tpu.core_type<tc>} {
    %c0 = arith.constant 0 : index
    %c0_0 = arith.constant 0 : index
    %0 = vector.load %arg1[%c0, %c0_0] : memref<8x8xi8, #tpu.memory_space<vmem>>, vector<8x8xi8>
    %1 = arith.extsi %0 : vector<8x8xi8> to vector<8x8xi32>
    %c0_i32 = arith.constant 0 : i32
    %2 = vector.broadcast %c0_i32 : i32 to vector<8x8xi32>
    %3 = arith.cmpi ne, %1, %2 : vector<8x8xi32>
    %c0_1 = arith.constant 0 : index
    %c0_2 = arith.constant 0 : index
    %4 = vector.load %arg0[%c0_1, %c0_2] : memref<8x16xf32, #tpu.memory_space<vmem>>, vector<8x16xf32>
    %c0_3 = arith.constant 0 : index
    %c0_4 = arith.constant 0 : index
    %5 = vector.load %arg2[%c0_3, %c0_4] : memref<16x64xbf16, #tpu.memory_space<vmem>>, vector<16x64xbf16>
    %c0_5 = arith.constant 0 : index
    %c0_6 = arith.constant 0 : index
    %6 = vector.load %arg3[%c0_5, %c0_6] : memref<1x64xf32, #tpu.memory_space<vmem>>, vector<1x64xf32>
    %c0_7 = arith.constant 0 : index
    %c0_8 = arith.constant 0 : index
    %7 = vector.load %arg4[%c0_7, %c0_8] : memref<1x16xf32, #tpu.memory_space<vmem>>, vector<1x16xf32>
    %c0_9 = arith.constant 0 : index
    %c0_10 = arith.constant 0 : index
    %8 = vector.load %arg5[%c0_9, %c0_10] : memref<1x16xf32, #tpu.memory_space<vmem>>, vector<1x16xf32>
    %9 = arith.truncf %4 : vector<8x16xf32> to vector<8x16xbf16>
    %cst = arith.constant dense<0.000000e+00> : vector<8x64xf32>
    %10 = tpu.matmul %9, %5, %cst {dimension_numbers = #tpu.dot_dimension_numbers<[1], [0], [0], [1], [0, 0, 1, 1], [], []>} : vector<8x16xbf16>, vector<16x64xbf16>, vector<8x64xf32> -> vector<8x64xf32>
    %11 = vector.broadcast %6 : vector<1x64xf32> to vector<8x64xf32>
    %12 = arith.addf %10, %11 : vector<8x64xf32>
    %13 = vector.extract_strided_slice %12 {offsets = [0, 0], sizes = [8, 16], strides = [1, 1]} : vector<8x64xf32> to vector<8x16xf32>
    %cst_11 = arith.constant 0.353553385 : f32
    %14 = vector.broadcast %cst_11 : f32 to vector<8x16xf32>
    %15 = arith.mulf %13, %14 : vector<8x16xf32>
    %16 = vector.extract_strided_slice %12 {offsets = [0, 16], sizes = [8, 16], strides = [1, 1]} : vector<8x64xf32> to vector<8x16xf32>
    %17 = vector.extract_strided_slice %12 {offsets = [0, 32], sizes = [8, 16], strides = [1, 1]} : vector<8x64xf32> to vector<8x16xf32>
    %18 = vector.extract_strided_slice %12 {offsets = [0, 48], sizes = [8, 16], strides = [1, 1]} : vector<8x64xf32> to vector<8x16xf32>
    %19 = arith.truncf %15 : vector<8x16xf32> to vector<8x16xbf16>
    %20 = arith.truncf %16 : vector<8x16xf32> to vector<8x16xbf16>
    %21 = arith.truncf %17 : vector<8x16xf32> to vector<8x16xbf16>
    %22 = vector.extract_strided_slice %19 {offsets = [0, 0], sizes = [8, 8], strides = [1, 1]} : vector<8x16xbf16> to vector<8x8xbf16>
    %23 = vector.extract_strided_slice %20 {offsets = [0, 0], sizes = [8, 8], strides = [1, 1]} : vector<8x16xbf16> to vector<8x8xbf16>
    %24 = vector.extract_strided_slice %21 {offsets = [0, 0], sizes = [8, 8], strides = [1, 1]} : vector<8x16xbf16> to vector<8x8xbf16>
    %cst_12 = arith.constant dense<0.000000e+00> : vector<8x8xf32>
    %25 = tpu.matmul %22, %23, %cst_12 {dimension_numbers = #tpu.dot_dimension_numbers<[1], [1], [0], [0], [0, 0, 1, 0], [], []>} : vector<8x8xbf16>, vector<8x8xbf16>, vector<8x8xf32> -> vector<8x8xf32>
    %cst_13 = arith.constant -1.000000e+30 : f32
    %26 = vector.broadcast %cst_13 : f32 to vector<8x8xf32>
    %27 = arith.select %3, %25, %26 : vector<8x8xi1>, vector<8x8xf32>
    %cst_14 = arith.constant dense<0xFF800000> : vector<8xf32>
    %28 = vector.multi_reduction <maximumf>, %27, %cst_14 [1] : vector<8x8xf32> to vector<8xf32>
    %29 = vector.shape_cast %28 : vector<8xf32> to vector<8x1xf32>
    %30 = vector.broadcast %29 : vector<8x1xf32> to vector<8x8xf32>
    %31 = arith.subf %27, %30 : vector<8x8xf32>
    %32 = math.exp %31 : vector<8x8xf32>
    %cst_15 = arith.constant dense<0.000000e+00> : vector<8xf32>
    %33 = vector.multi_reduction <add>, %32, %cst_15 [1] : vector<8x8xf32> to vector<8xf32>
    %34 = vector.shape_cast %33 : vector<8xf32> to vector<8x1xf32>
    %cst_16 = arith.constant -1.000000e+29 : f32
    %35 = vector.broadcast %cst_16 : f32 to vector<8x1xf32>
    %36 = arith.cmpf ogt, %29, %35 : vector<8x1xf32>
    %37 = tpu.reciprocal %34 {approx = true} : vector<8x1xf32> -> vector<8x1xf32>
    %cst_17 = arith.constant 0.000000e+00 : f32
    %38 = vector.broadcast %cst_17 : f32 to vector<8x1xf32>
    %39 = arith.select %36, %37, %38 : vector<8x1xi1>, vector<8x1xf32>
    %40 = vector.broadcast %39 : vector<8x1xf32> to vector<8x8xf32>
    %41 = arith.mulf %32, %40 : vector<8x8xf32>
    %42 = arith.truncf %41 : vector<8x8xf32> to vector<8x8xbf16>
    %cst_18 = arith.constant dense<0.000000e+00> : vector<8x8xf32>
    %43 = tpu.matmul %42, %24, %cst_18 {dimension_numbers = #tpu.dot_dimension_numbers<[1], [0], [0], [1], [0, 0, 1, 1], [], []>} : vector<8x8xbf16>, vector<8x8xbf16>, vector<8x8xf32> -> vector<8x8xf32>
    %44 = vector.extract_strided_slice %19 {offsets = [0, 8], sizes = [8, 8], strides = [1, 1]} : vector<8x16xbf16> to vector<8x8xbf16>
    %45 = vector.extract_strided_slice %20 {offsets = [0, 8], sizes = [8, 8], strides = [1, 1]} : vector<8x16xbf16> to vector<8x8xbf16>
    %46 = vector.extract_strided_slice %21 {offsets = [0, 8], sizes = [8, 8], strides = [1, 1]} : vector<8x16xbf16> to vector<8x8xbf16>
    %cst_19 = arith.constant dense<0.000000e+00> : vector<8x8xf32>
    %47 = tpu.matmul %44, %45, %cst_19 {dimension_numbers = #tpu.dot_dimension_numbers<[1], [1], [0], [0], [0, 0, 1, 0], [], []>} : vector<8x8xbf16>, vector<8x8xbf16>, vector<8x8xf32> -> vector<8x8xf32>
    %cst_20 = arith.constant -1.000000e+30 : f32
    %48 = vector.broadcast %cst_20 : f32 to vector<8x8xf32>
    %49 = arith.select %3, %47, %48 : vector<8x8xi1>, vector<8x8xf32>
    %cst_21 = arith.constant dense<0xFF800000> : vector<8xf32>
    %50 = vector.multi_reduction <maximumf>, %49, %cst_21 [1] : vector<8x8xf32> to vector<8xf32>
    %51 = vector.shape_cast %50 : vector<8xf32> to vector<8x1xf32>
    %52 = vector.broadcast %51 : vector<8x1xf32> to vector<8x8xf32>
    %53 = arith.subf %49, %52 : vector<8x8xf32>
    %54 = math.exp %53 : vector<8x8xf32>
    %cst_22 = arith.constant dense<0.000000e+00> : vector<8xf32>
    %55 = vector.multi_reduction <add>, %54, %cst_22 [1] : vector<8x8xf32> to vector<8xf32>
    %56 = vector.shape_cast %55 : vector<8xf32> to vector<8x1xf32>
    %cst_23 = arith.constant -1.000000e+29 : f32
    %57 = vector.broadcast %cst_23 : f32 to vector<8x1xf32>
    %58 = arith.cmpf ogt, %51, %57 : vector<8x1xf32>
    %59 = tpu.reciprocal %56 {approx = true} : vector<8x1xf32> -> vector<8x1xf32>
    %cst_24 = arith.constant 0.000000e+00 : f32
    %60 = vector.broadcast %cst_24 : f32 to vector<8x1xf32>
    %61 = arith.select %58, %59, %60 : vector<8x1xi1>, vector<8x1xf32>
    %62 = vector.broadcast %61 : vector<8x1xf32> to vector<8x8xf32>
    %63 = arith.mulf %54, %62 : vector<8x8xf32>
    %64 = arith.truncf %63 : vector<8x8xf32> to vector<8x8xbf16>
    %cst_25 = arith.constant dense<0.000000e+00> : vector<8x8xf32>
    %65 = tpu.matmul %64, %46, %cst_25 {dimension_numbers = #tpu.dot_dimension_numbers<[1], [0], [0], [1], [0, 0, 1, 1], [], []>} : vector<8x8xbf16>, vector<8x8xbf16>, vector<8x8xf32> -> vector<8x8xf32>
    %66 = tpu.concatenate %43, %65 in 1 : vector<8x8xf32>, vector<8x8xf32> -> vector<8x16xf32>
    %67 = arith.addf %66, %18 : vector<8x16xf32>
    %cst_26 = arith.constant dense<0.000000e+00> : vector<16xf32>
    %68 = vector.multi_reduction <add>, %67, %cst_26 [0] : vector<8x16xf32> to vector<16xf32>
    %69 = vector.shape_cast %68 : vector<16xf32> to vector<1x16xf32>
    %cst_27 = arith.constant 8.000000e+00 : f32
    %70 = vector.broadcast %cst_27 : f32 to vector<1x16xf32>
    %71 = arith.divf %69, %70 : vector<1x16xf32>
    %72 = arith.mulf %67, %67 : vector<8x16xf32>
    %cst_28 = arith.constant dense<0.000000e+00> : vector<16xf32>
    %73 = vector.multi_reduction <add>, %72, %cst_28 [0] : vector<8x16xf32> to vector<16xf32>
    %74 = vector.shape_cast %73 : vector<16xf32> to vector<1x16xf32>
    %cst_29 = arith.constant 8.000000e+00 : f32
    %75 = vector.broadcast %cst_29 : f32 to vector<1x16xf32>
    %76 = arith.divf %74, %75 : vector<1x16xf32>
    %77 = arith.mulf %71, %71 : vector<1x16xf32>
    %78 = arith.subf %76, %77 : vector<1x16xf32>
    %cst_30 = arith.constant 0.000000e+00 : f32
    %79 = vector.broadcast %cst_30 : f32 to vector<1x16xf32>
    %80 = arith.maximumf %78, %79 : vector<1x16xf32>
    %cst_31 = arith.constant 9.99999974E-6 : f32
    %81 = vector.broadcast %cst_31 : f32 to vector<1x16xf32>
    %82 = arith.addf %80, %81 : vector<1x16xf32>
    %83 = math.rsqrt %82 : vector<1x16xf32>
    %84 = arith.mulf %7, %83 : vector<1x16xf32>
    %85 = vector.broadcast %71 : vector<1x16xf32> to vector<8x16xf32>
    %86 = arith.subf %67, %85 : vector<8x16xf32>
    %87 = vector.broadcast %84 : vector<1x16xf32> to vector<8x16xf32>
    %88 = arith.mulf %86, %87 : vector<8x16xf32>
    %89 = vector.broadcast %8 : vector<1x16xf32> to vector<8x16xf32>
    %90 = arith.addf %88, %89 : vector<8x16xf32>
    %cst_32 = arith.constant 0.000000e+00 : f32
    %91 = vector.broadcast %cst_32 : f32 to vector<8x16xf32>
    %92 = arith.cmpf ogt, %90, %91 : vector<8x16xf32>
    %cst_33 = arith.constant 1.000000e-01 : f32
    %93 = vector.broadcast %cst_33 : f32 to vector<8x16xf32>
    %94 = arith.mulf %93, %90 : vector<8x16xf32>
    %95 = arith.select %92, %90, %94 : vector<8x16xi1>, vector<8x16xf32>
    %c0_34 = arith.constant 0 : index
    %c0_35 = arith.constant 0 : index
    %96 = vector.load %arg6[%c0_34, %c0_35] : memref<16x64xbf16, #tpu.memory_space<vmem>>, vector<16x64xbf16>
    %c0_36 = arith.constant 0 : index
    %c0_37 = arith.constant 0 : index
    %97 = vector.load %arg7[%c0_36, %c0_37] : memref<1x64xf32, #tpu.memory_space<vmem>>, vector<1x64xf32>
    %c0_38 = arith.constant 0 : index
    %c0_39 = arith.constant 0 : index
    %98 = vector.load %arg8[%c0_38, %c0_39] : memref<1x16xf32, #tpu.memory_space<vmem>>, vector<1x16xf32>
    %c0_40 = arith.constant 0 : index
    %c0_41 = arith.constant 0 : index
    %99 = vector.load %arg9[%c0_40, %c0_41] : memref<1x16xf32, #tpu.memory_space<vmem>>, vector<1x16xf32>
    %100 = arith.truncf %95 : vector<8x16xf32> to vector<8x16xbf16>
    %cst_42 = arith.constant dense<0.000000e+00> : vector<8x64xf32>
    %101 = tpu.matmul %100, %96, %cst_42 {dimension_numbers = #tpu.dot_dimension_numbers<[1], [0], [0], [1], [0, 0, 1, 1], [], []>} : vector<8x16xbf16>, vector<16x64xbf16>, vector<8x64xf32> -> vector<8x64xf32>
    %102 = vector.broadcast %97 : vector<1x64xf32> to vector<8x64xf32>
    %103 = arith.addf %101, %102 : vector<8x64xf32>
    %104 = vector.extract_strided_slice %103 {offsets = [0, 0], sizes = [8, 16], strides = [1, 1]} : vector<8x64xf32> to vector<8x16xf32>
    %cst_43 = arith.constant 0.353553385 : f32
    %105 = vector.broadcast %cst_43 : f32 to vector<8x16xf32>
    %106 = arith.mulf %104, %105 : vector<8x16xf32>
    %107 = vector.extract_strided_slice %103 {offsets = [0, 16], sizes = [8, 16], strides = [1, 1]} : vector<8x64xf32> to vector<8x16xf32>
    %108 = vector.extract_strided_slice %103 {offsets = [0, 32], sizes = [8, 16], strides = [1, 1]} : vector<8x64xf32> to vector<8x16xf32>
    %109 = vector.extract_strided_slice %103 {offsets = [0, 48], sizes = [8, 16], strides = [1, 1]} : vector<8x64xf32> to vector<8x16xf32>
    %110 = arith.truncf %106 : vector<8x16xf32> to vector<8x16xbf16>
    %111 = arith.truncf %107 : vector<8x16xf32> to vector<8x16xbf16>
    %112 = arith.truncf %108 : vector<8x16xf32> to vector<8x16xbf16>
    %113 = vector.extract_strided_slice %110 {offsets = [0, 0], sizes = [8, 8], strides = [1, 1]} : vector<8x16xbf16> to vector<8x8xbf16>
    %114 = vector.extract_strided_slice %111 {offsets = [0, 0], sizes = [8, 8], strides = [1, 1]} : vector<8x16xbf16> to vector<8x8xbf16>
    %115 = vector.extract_strided_slice %112 {offsets = [0, 0], sizes = [8, 8], strides = [1, 1]} : vector<8x16xbf16> to vector<8x8xbf16>
    %cst_44 = arith.constant dense<0.000000e+00> : vector<8x8xf32>
    %116 = tpu.matmul %113, %114, %cst_44 {dimension_numbers = #tpu.dot_dimension_numbers<[1], [1], [0], [0], [0, 0, 1, 0], [], []>} : vector<8x8xbf16>, vector<8x8xbf16>, vector<8x8xf32> -> vector<8x8xf32>
    %cst_45 = arith.constant -1.000000e+30 : f32
    %117 = vector.broadcast %cst_45 : f32 to vector<8x8xf32>
    %118 = arith.select %3, %116, %117 : vector<8x8xi1>, vector<8x8xf32>
    %cst_46 = arith.constant dense<0xFF800000> : vector<8xf32>
    %119 = vector.multi_reduction <maximumf>, %118, %cst_46 [1] : vector<8x8xf32> to vector<8xf32>
    %120 = vector.shape_cast %119 : vector<8xf32> to vector<8x1xf32>
    %121 = vector.broadcast %120 : vector<8x1xf32> to vector<8x8xf32>
    %122 = arith.subf %118, %121 : vector<8x8xf32>
    %123 = math.exp %122 : vector<8x8xf32>
    %cst_47 = arith.constant dense<0.000000e+00> : vector<8xf32>
    %124 = vector.multi_reduction <add>, %123, %cst_47 [1] : vector<8x8xf32> to vector<8xf32>
    %125 = vector.shape_cast %124 : vector<8xf32> to vector<8x1xf32>
    %cst_48 = arith.constant -1.000000e+29 : f32
    %126 = vector.broadcast %cst_48 : f32 to vector<8x1xf32>
    %127 = arith.cmpf ogt, %120, %126 : vector<8x1xf32>
    %128 = tpu.reciprocal %125 {approx = true} : vector<8x1xf32> -> vector<8x1xf32>
    %cst_49 = arith.constant 0.000000e+00 : f32
    %129 = vector.broadcast %cst_49 : f32 to vector<8x1xf32>
    %130 = arith.select %127, %128, %129 : vector<8x1xi1>, vector<8x1xf32>
    %131 = vector.broadcast %130 : vector<8x1xf32> to vector<8x8xf32>
    %132 = arith.mulf %123, %131 : vector<8x8xf32>
    %133 = arith.truncf %132 : vector<8x8xf32> to vector<8x8xbf16>
    %cst_50 = arith.constant dense<0.000000e+00> : vector<8x8xf32>
    %134 = tpu.matmul %133, %115, %cst_50 {dimension_numbers = #tpu.dot_dimension_numbers<[1], [0], [0], [1], [0, 0, 1, 1], [], []>} : vector<8x8xbf16>, vector<8x8xbf16>, vector<8x8xf32> -> vector<8x8xf32>
    %135 = vector.extract_strided_slice %110 {offsets = [0, 8], sizes = [8, 8], strides = [1, 1]} : vector<8x16xbf16> to vector<8x8xbf16>
    %136 = vector.extract_strided_slice %111 {offsets = [0, 8], sizes = [8, 8], strides = [1, 1]} : vector<8x16xbf16> to vector<8x8xbf16>
    %137 = vector.extract_strided_slice %112 {offsets = [0, 8], sizes = [8, 8], strides = [1, 1]} : vector<8x16xbf16> to vector<8x8xbf16>
    %cst_51 = arith.constant dense<0.000000e+00> : vector<8x8xf32>
    %138 = tpu.matmul %135, %136, %cst_51 {dimension_numbers = #tpu.dot_dimension_numbers<[1], [1], [0], [0], [0, 0, 1, 0], [], []>} : vector<8x8xbf16>, vector<8x8xbf16>, vector<8x8xf32> -> vector<8x8xf32>
    %cst_52 = arith.constant -1.000000e+30 : f32
    %139 = vector.broadcast %cst_52 : f32 to vector<8x8xf32>
    %140 = arith.select %3, %138, %139 : vector<8x8xi1>, vector<8x8xf32>
    %cst_53 = arith.constant dense<0xFF800000> : vector<8xf32>
    %141 = vector.multi_reduction <maximumf>, %140, %cst_53 [1] : vector<8x8xf32> to vector<8xf32>
    %142 = vector.shape_cast %141 : vector<8xf32> to vector<8x1xf32>
    %143 = vector.broadcast %142 : vector<8x1xf32> to vector<8x8xf32>
    %144 = arith.subf %140, %143 : vector<8x8xf32>
    %145 = math.exp %144 : vector<8x8xf32>
    %cst_54 = arith.constant dense<0.000000e+00> : vector<8xf32>
    %146 = vector.multi_reduction <add>, %145, %cst_54 [1] : vector<8x8xf32> to vector<8xf32>
    %147 = vector.shape_cast %146 : vector<8xf32> to vector<8x1xf32>
    %cst_55 = arith.constant -1.000000e+29 : f32
    %148 = vector.broadcast %cst_55 : f32 to vector<8x1xf32>
    %149 = arith.cmpf ogt, %142, %148 : vector<8x1xf32>
    %150 = tpu.reciprocal %147 {approx = true} : vector<8x1xf32> -> vector<8x1xf32>
    %cst_56 = arith.constant 0.000000e+00 : f32
    %151 = vector.broadcast %cst_56 : f32 to vector<8x1xf32>
    %152 = arith.select %149, %150, %151 : vector<8x1xi1>, vector<8x1xf32>
    %153 = vector.broadcast %152 : vector<8x1xf32> to vector<8x8xf32>
    %154 = arith.mulf %145, %153 : vector<8x8xf32>
    %155 = arith.truncf %154 : vector<8x8xf32> to vector<8x8xbf16>
    %cst_57 = arith.constant dense<0.000000e+00> : vector<8x8xf32>
    %156 = tpu.matmul %155, %137, %cst_57 {dimension_numbers = #tpu.dot_dimension_numbers<[1], [0], [0], [1], [0, 0, 1, 1], [], []>} : vector<8x8xbf16>, vector<8x8xbf16>, vector<8x8xf32> -> vector<8x8xf32>
    %157 = tpu.concatenate %134, %156 in 1 : vector<8x8xf32>, vector<8x8xf32> -> vector<8x16xf32>
    %158 = arith.addf %157, %109 : vector<8x16xf32>
    %cst_58 = arith.constant dense<0.000000e+00> : vector<16xf32>
    %159 = vector.multi_reduction <add>, %158, %cst_58 [0] : vector<8x16xf32> to vector<16xf32>
    %160 = vector.shape_cast %159 : vector<16xf32> to vector<1x16xf32>
    %cst_59 = arith.constant 8.000000e+00 : f32
    %161 = vector.broadcast %cst_59 : f32 to vector<1x16xf32>
    %162 = arith.divf %160, %161 : vector<1x16xf32>
    %163 = arith.mulf %158, %158 : vector<8x16xf32>
    %cst_60 = arith.constant dense<0.000000e+00> : vector<16xf32>
    %164 = vector.multi_reduction <add>, %163, %cst_60 [0] : vector<8x16xf32> to vector<16xf32>
    %165 = vector.shape_cast %164 : vector<16xf32> to vector<1x16xf32>
    %cst_61 = arith.constant 8.000000e+00 : f32
    %166 = vector.broadcast %cst_61 : f32 to vector<1x16xf32>
    %167 = arith.divf %165, %166 : vector<1x16xf32>
    %168 = arith.mulf %162, %162 : vector<1x16xf32>
    %169 = arith.subf %167, %168 : vector<1x16xf32>
    %cst_62 = arith.constant 0.000000e+00 : f32
    %170 = vector.broadcast %cst_62 : f32 to vector<1x16xf32>
    %171 = arith.maximumf %169, %170 : vector<1x16xf32>
    %cst_63 = arith.constant 9.99999974E-6 : f32
    %172 = vector.broadcast %cst_63 : f32 to vector<1x16xf32>
    %173 = arith.addf %171, %172 : vector<1x16xf32>
    %174 = math.rsqrt %173 : vector<1x16xf32>
    %175 = arith.mulf %98, %174 : vector<1x16xf32>
    %176 = vector.broadcast %162 : vector<1x16xf32> to vector<8x16xf32>
    %177 = arith.subf %158, %176 : vector<8x16xf32>
    %178 = vector.broadcast %175 : vector<1x16xf32> to vector<8x16xf32>
    %179 = arith.mulf %177, %178 : vector<8x16xf32>
    %180 = vector.broadcast %99 : vector<1x16xf32> to vector<8x16xf32>
    %181 = arith.addf %179, %180 : vector<8x16xf32>
    %cst_64 = arith.constant 0.000000e+00 : f32
    %182 = vector.broadcast %cst_64 : f32 to vector<8x16xf32>
    %183 = arith.cmpf ogt, %181, %182 : vector<8x16xf32>
    %cst_65 = arith.constant 1.000000e-01 : f32
    %184 = vector.broadcast %cst_65 : f32 to vector<8x16xf32>
    %185 = arith.mulf %184, %181 : vector<8x16xf32>
    %186 = arith.select %183, %181, %185 : vector<8x16xi1>, vector<8x16xf32>
    %c0_66 = arith.constant 0 : index
    %c0_67 = arith.constant 0 : index
    %187 = vector.load %arg10[%c0_66, %c0_67] : memref<8x16xf32, #tpu.memory_space<vmem>>, vector<8x16xf32>
    tpu.vector_store %arg10[%c0_66, %c0_67], %186 {strides = array<i32>} : memref<8x16xf32, #tpu.memory_space<vmem>>, vector<8x16xf32>,
    return
  }
}

</mosaic_0001>

<bundles_post_ra>
// kernel: tpu_custom_call.1
= control target key start
LH: loop header
LB: loop body
LE: loop exit
PB: predicated region body
PF: predicated region fallthrough
CT: control target
= control target key end

     0   :  { %15 = vsyncpa [#allocation3], 0  ;;  %s1212_s0 = inlined_call_operand.hbm [shape: f32[8,16], index: 0, kind: input, shape index: {}]   ;;  %s1213_s1 = inlined_call_operand.vmem [shape: s8[8,8], index: 1, kind: input, shape index: {}]   ;;  %s1214_s2 = inlined_call_operand.hbm [shape: bf16[16,64], index: 2, kind: input, shape index: {}]   ;;  %s1215_s3 = inlined_call_operand.vmem [shape: f32[1,64], index: 3, kind: input, shape index: {}]   ;;  %s1216_s4 = inlined_call_operand.vmem [shape: f32[1,16], index: 4, kind: input, shape index: {}]   ;;  %s1217_s5 = inlined_call_operand.vmem [shape: f32[1,16], index: 5, kind: input, shape index: {}]   ;;  %s1218_s6 = inlined_call_operand.vmem [shape: bf16[16,64], index: 6, kind: input, shape index: {}]   ;;  %s1219_s7 = inlined_call_operand.vmem [shape: f32[1,64], index: 7, kind: input, shape index: {}]   ;;  %s1220_s8 = inlined_call_operand.vmem [shape: f32[1,16], index: 8, kind: input, shape index: {}]   ;;  %s1221_s9 = inlined_call_operand.vmem [shape: f32[1,16], index: 9, kind: input, shape index: {}]   ;;  %s1222_s10 = inlined_call_operand.hbm [shape: f32[8,16], index: 10, kind: output, shape index: {}]  }
   0x1   :  { %16 = vsyncpa [#allocation6], 0 }
   0x2   :  { %17 = vsyncpa [#allocation4], 0  ;;  %s974_s13 = smov [#allocation2]   ;;  %s975_s15 = smov [#allocation5]  }
   0x3   :  { %s24_s14 = sshll.u32 %s974_s13, 4  ;;  %s35_s16 = sshll.u32 %s975_s15, 4  ;;  %s25_s14 = int_to_ptr.vmem [resolvable:$true] %s24_s14  ;;  %s1043_s16 = int_to_ptr.vmem [resolvable:$true] %s35_s16 }
   0x4   :  { %s902_s19 = scalar_lea.hbm %s1212_s0, 128 }
   0x5   :  { %p903_p0 = scmp.ne.s32.totalorder %s1212_s0, %s902_s19  ;;  %p906_p1 = scmp.lt.u32.totalorder %s902_s19, %s1212_s0 }
   0x7   :  { %p908_p2 = pnand %p906_p1, %p903_p0 }
   0x9   :  { %911 = shalt.err (!%p908_p2)
}
   0xa   :  { %s912_s24 = scalar_lea.vmem %s25_s14, 128  ;;  %p917_p4 = scmp.lt.s32.totalorder %s25_s14, %s25_s14 }
   0xb   :  { %p913_p3 = scmp.ne.s32.totalorder %s25_s14, %s912_s24  ;;  %p918_p5 = scmp.lt.s32.totalorder %s912_s24, %s912_s24 }
   0xd   :  { %p919_p6 = por %p918_p5, %p917_p4 }
   0xf   :  { %p920_p7 = pnand %p919_p6, %p913_p3 }
  0x11   :  { %923 = shalt.err (!%p920_p7)
}
  0x12   :  { %27 = dma.hbm_to_vmem [thread:$0]  %s1212_s0, 128, %s25_s14, [#allocation3]  }
  0x13   :  { %s924_s29 = scalar_lea.hbm %s1214_s2, 128 }
  0x14   :  { %p925_p8 = scmp.ne.s32.totalorder %s1214_s2, %s924_s29  ;;  %p928_p9 = scmp.lt.u32.totalorder %s924_s29, %s1214_s2 }
  0x16   :  { %p930_p10 = pnand %p928_p9, %p925_p8 }
  0x18   :  { %933 = shalt.err (!%p930_p10)
}
  0x19   :  { %s934_s15 = scalar_lea.vmem %s1043_s16, 128  ;;  %p939_p12 = scmp.lt.s32.totalorder %s1043_s16, %s1043_s16 }
  0x1a   :  { %p935_p11 = scmp.ne.s32.totalorder %s1043_s16, %s934_s15  ;;  %p940_p13 = scmp.lt.s32.totalorder %s934_s15, %s934_s15 }
  0x1c   :  { %p941_p0 = por %p940_p13, %p939_p12 }
  0x1e   :  { %p942_p1 = pnand %p941_p0, %p935_p11 }
  0x20   :  { %945 = shalt.err (!%p942_p1)
}
  0x21   :  { %s976_s0 = smov 64   ;;  %s977_s14 = smov 4  }
  0x22   :  { %41 = dma.hbm_to_vmem [thread:$0]  %s1214_s2, 128, %s1043_s16, [#allocation6], %s976_s0, %s976_s0, %s977_s14  }
  0x23   :  { %968 = dma.done.wait [#allocation3], 128  }
  0x24   :  { %969 = vsyncadd [#allocation3], 4294967168 }
  0x25   :  { %970 = dma.done.wait [#allocation6], 128  }
  0x26   :  { %971 = vsyncadd [#allocation6], 4294967168  ;;  %v978_v0 = vmov 0.0   ;;  %vm979_vm0 = vmmov 0   ;;  %v880_v1 = vld [vmem:[#allocation5] sm:$0xff]   ;;  %v66_v2 = vld [vmem:[#allocation2] sm:$0xff] }
  0x27   :  { %806 = vmatprep.subr.bf16.mxu0 %v978_v0  ;;  %808 = vmatprep.mubr.msk.bf16.mxu0 %vm979_vm0, %v978_v0  ;;  %v72_v3 = vpack.c.bf16 %v66_v2, %v66_v2  ;;  %vm85_vm1 = vcmask 130048   ;;  %v770_v4 = vld [vmem:[%s1215_s3] ss:$0 sm:$0xff]  ;;  %s980_s19 = smov 112   ;;  %s981_s20 = smov 120   ;;  %vm135_vm2 = vcmask 64512  }
  0x28   :  { %812 = vmatprep.subr.bf16.mxu1 %v978_v0  ;;  %814 = vmatprep.mubr.msk.bf16.mxu1 %vm979_vm0, %v978_v0  ;;  %s982_s21 = smov 104   ;;  %v63_v18 = vld [vmem:[%s1213_s1] sm:$0x3]  ;;  %s983_s1 = smov 96   ;;  %vm202_vm4 = vcmask 1043456  }
  0x29   :  { %807 = vmatpush3.bf16.msra.mxu0 %v880_v1  ;;  %v64_v19 = vunpack.c.0.s8 %v63_v18  ;;  %s984_s23 = smov 88   ;;  %s985_s24 = smov 80   ;;  %v881_v2 = vld [vmem:[%s1218_s6] sm:$0xff]  }
  0x2a   :  { %818 = vmatprep.subr.bf16.mxu0 %v978_v0  ;;  %s986_s25 = smov 8   ;;  %s987_s15 = smov [#allocation7]  }
  0x2b   :  { %vm1103_vm3 = vcmp.ne.s32.totalorder %v64_v19, 0  ;;  %s760_s0 = sshll.u32 %s987_s15, 4  ;;  %s761_s0 = int_to_ptr.vmem [resolvable:$true] %s760_s0 }
  0x2c   :  { %809 = vmatmul.mubr.msk.bf16.vlgmr.msra.gmra.mrb[0].mxu0 %vm85_vm1, %v72_v3  ;;  %p951_p3 = scmp.lt.s32.totalorder %s761_s0, %s761_s0 }
  0x2d   :  { %820 = vmatprep.mubr.msk.bf16.mxu0 %vm979_vm0, %v978_v0 }
  0xff   :  { %v123_v5 = vpop.f32.mrb[0].mxu0 }
 0x100   :  { %v124_v6 = vadd.f32 %v770_v4, %v123_v5  ;;  %v810_v7 = vpop.f32.mrb[1].mxu0 }
 0x101   :  { %v126_v8 = vpop.f32.mrb[2].mxu0 }
 0x102   :  { %v131_v9 = vpack.c.bf16 %v124_v6, %v124_v6  ;;  %v811_v10 = vpop.f32.mrb[3].mxu0  ;;  %v129_v11 = vmul.f32 0.35355338, %v124_v6 }
 0x104   :  { %133 = vrot.lane.b32.xlu0 %v131_v9, %s980_s19  ;;  %v130_v12 = vpack.c.bf16 %v129_v11, %v129_v11 }
 0x106   :  { %247 = vrot.lane.b32.xlu1 %v130_v12, %s981_s20 }
 0x108   :  { %249 = vrot.lane.b32.xlu0 %v131_v9, %s982_s21 }
 0x176   :  { %v134_v13 = vpop.permute.xlu0 %133 }
 0x177   :  { %v140_v14 = vsel %vm135_vm2, %v134_v13, 0 }
 0x178   :  { %813 = vmatpush3.bf16.xpose.msra.mxu1 %v140_v14  ;;  %v248_v17 = vpop.permute.xlu1 %247 }
 0x179   :  { %824 = vmatprep.subr.bf16.mxu1 %v978_v0 }
 0x17a   :  { %v250_v15 = vpop.permute.xlu0 %249 }
 0x17b   :  { %v255_v16 = vsel %vm135_vm2, %v250_v15, 0 }
 0x17f   :  { %815 = vmatmul.mubr.msk.bf16.vlgmr.msra.gmra.mrb[0].mxu1 %vm135_vm2, %v130_v12 }
 0x180   :  { %825 = vmatpush3.bf16.xpose.msra.mxu1 %v255_v16  ;;  %826 = vmatprep.mubr.msk.bf16.mxu1 %vm979_vm0, %v978_v0 }
 0x181   :  { %836 = vmatprep.subr.bf16.mxu1 %v978_v0 }
 0x187   :  { %827 = vmatmul.mubr.msk.bf16.vlgmr.msra.gmra.mrb[4].mxu1 %vm135_vm2, %v248_v17 }
 0x188   :  { %838 = vmatprep.mubr.msk.bf16.mxu1 %vm979_vm0, %v978_v0  ;;  %837 = vmatpush3.bf16.msra.mxu1 %v881_v2 }
 0x189   :  { %848 = vmatprep.subr.bf16.mxu1 %v978_v0 }
 0x252   :  { %v176_v21 = vpop.f32.mrb[0].mxu1 }
 0x253   :  { %v182_v22 = vsel %vm1103_vm3, %v176_v21, -1e+30  ;;  %v816_v23 = vpop.f32.mrb[1].mxu1 }
 0x254   :  { %v179_v24 = vpop.f32.mrb[2].mxu1  ;;  %v183_v25 = vsel %vm135_vm2, %v182_v22, -inf }
 0x255   :  { %v817_v26 = vpop.f32.mrb[3].mxu1  ;;  %184 = vmax.xlane.f32.xlu1 %v183_v25 }
 0x25a   :  { %v291_v27 = vpop.f32.mrb[4].mxu1 }
 0x25b   :  { %v297_v28 = vsel %vm1103_vm3, %v291_v27, -1e+30  ;;  %v828_v29 = vpop.f32.mrb[5].mxu1 }
 0x25c   :  { %v294_v30 = vpop.f32.mrb[6].mxu1  ;;  %v298_v31 = vsel %vm135_vm2, %v297_v28, -inf  ;;  %v396_v29 = vlaneseq }
 0x25d   :  { %v829_v32 = vpop.f32.mrb[7].mxu1  ;;  %299 = vmax.xlane.f32.xlu0 %v298_v31  ;;  %v70_v31 = vld [vmem:[%s1216_s4] sm:$0x1] }
 0x25e   :  { %v1136_v30 = vshrl.u32 %v396_v29, 7 }
 0x260   :  { %v398_v32 = vsub.s32 0, %v1136_v30 }
 0x2e2   :  { %v185_v33 = vpop.xlane.xlu1 %184 }
 0x2e3   :  { %v186_v34 = vsub.f32 %v182_v22, %v185_v33  ;;  %vm192_vm5 = vcmp.gt.f32.partialorder %v185_v33, -1e+29 }
 0x2e5   :  { %v187_v35 = vmul.f32 1.442695, %v186_v34 }
 0x2e7   :  { %882 = vpow2.f32 %v187_v35 }
 0x2ea   :  { %v300_v36 = vpop.xlane.xlu0 %299 }
 0x2eb   :  { %v301_v37 = vsub.f32 %v297_v28, %v300_v36  ;;  %vm307_vm6 = vcmp.gt.f32.partialorder %v300_v36, -1e+29 }
 0x2ed   :  { %v302_v38 = vmul.f32 1.442695, %v301_v37  ;;  %v777_v37 = vld [vmem:[%s1217_s5] ss:$0 sm:$0xff] }
 0x2ef   :  { %884 = vpow2.f32 %v302_v38 }
 0x2f1   :  { %v883_v39 = vpop.eup %882 }
 0x2f2   :  { %v189_v40 = vsel %vm135_vm2, %v883_v39, 0.0 }
 0x2f3   :  { %190 = vadd.xlane.f32.xlu0 %v189_v40 }
 0x2f9   :  { %v885_v41 = vpop.eup %884 }
 0x2fa   :  { %v304_v42 = vsel %vm135_vm2, %v885_v41, 0.0 }
 0x2fb   :  { %305 = vadd.xlane.f32.xlu1 %v304_v42 }
 0x309   :  { %197 = vrot.lane.b32.xlu0 %v131_v9, %s983_s1 }
 0x30c   :  { %312 = vrot.lane.b32.xlu1 %v131_v9, %s984_s23 }
 0x30d   :  { %366 = vrot.lane.b32.xlu0 %v124_v6, %s985_s24 }
 0x380   :  { %v191_v43 = vpop.xlane.xlu0 %190 }
 0x381   :  { %886 = vrcp.f32 %v191_v43  ;;  %v778_v43 = vld [vmem:[%s1219_s7] ss:$0 sm:$0xff] }
 0x384   :  { %v198_v44 = vpop.permute.xlu0 %197 }
 0x385   :  { %v204_v45 = vsel %vm202_vm4, %v198_v44, 0 }
 0x386   :  { %819 = vmatpush3.bf16.msra.mxu0 %v204_v45 }
 0x387   :  { %830 = vmatprep.subr.bf16.mxu0 %v978_v0 }
 0x388   :  { %v306_v46 = vpop.xlane.xlu1 %305  ;;  %v367_v4 = vpop.permute.xlu0 %366 }
 0x389   :  { %888 = vrcp.f32 %v306_v46 }
 0x38b   :  { %v887_v47 = vpop.eup %886 }
 0x38c   :  { %v194_v48 = vsel %vm192_vm5, %v887_v47, 0.0  ;;  %v313_v50 = vpop.permute.xlu1 %312 }
 0x38d   :  { %v195_v49 = vmul.f32 %v883_v39, %v194_v48  ;;  %v318_v52 = vsel %vm202_vm4, %v313_v50, 0 }
 0x38f   :  { %v196_v51 = vpack.c.bf16 %v195_v49, %v195_v49 }
 0x391   :  { %821 = vmatmul.mubr.msk.bf16.vlgmr.msra.gmra.mrb[4].mxu0 %vm135_vm2, %v196_v51 }
 0x392   :  { %831 = vmatpush3.bf16.msra.mxu0 %v318_v52  ;;  %832 = vmatprep.mubr.msk.bf16.mxu0 %vm979_vm0, %v978_v0 }
 0x393   :  { %v889_v53 = vpop.eup %888  ;;  %842 = vmatprep.subr.bf16.mxu0 %v978_v0 }
 0x394   :  { %v309_v54 = vsel %vm307_vm6, %v889_v53, 0.0 }
 0x395   :  { %v310_v55 = vmul.f32 %v885_v41, %v309_v54 }
 0x397   :  { %v311_v56 = vpack.c.bf16 %v310_v55, %v310_v55 }
 0x399   :  { %833 = vmatmul.mubr.msk.bf16.vlgmr.msra.gmra.mrb[8].mxu0 %vm135_vm2, %v311_v56 }
 0x39a   :  { %844 = vmatprep.mubr.msk.bf16.mxu0 %vm979_vm0, %v978_v0 }
 0x464   :  { %v240_v57 = vpop.f32.mrb[4].mxu0 }
 0x465   :  { %v822_v58 = vpop.f32.mrb[5].mxu0 }
 0x466   :  { %v243_v59 = vpop.f32.mrb[6].mxu0 }
 0x467   :  { %v823_v60 = vpop.f32.mrb[7].mxu0 }
 0x46c   :  { %v354_v61 = vpop.f32.mrb[8].mxu0 }
 0x46d   :  { %361 = vrot.lane.b32.xlu1 %v354_v61, %s986_s25  ;;  %v834_v62 = vpop.f32.mrb[9].mxu0 }
 0x46e   :  { %v357_v63 = vpop.f32.mrb[10].mxu0 }
 0x46f   :  { %v835_v1 = vpop.f32.mrb[11].mxu0 }
 0x4df   :  { %v362_v3 = vpop.permute.xlu1 %361 }
 0x4e0   :  { %v364_v5 = vsel %vm135_vm2, %v240_v57, %v362_v3 }
 0x4e1   :  { %v369_v6 = vadd.f32 %v367_v4, %v364_v5 }
 0x4e3   :  { %v370_v7 = vsel %vm85_vm1, %v369_v6, 0.0  ;;  %v379_v8 = vmul.f32 %v369_v6, %v369_v6 }
 0x4e4   :  { %v371_v9 = vrot.slane %v370_v7, 4 }
 0x4e5   :  { %v380_v10 = vsel %vm85_vm1, %v379_v8, 0.0 }
 0x4e6   :  { %v372_v11 = vadd.f32 %v371_v9, %v370_v7  ;;  %v381_v12 = vrot.slane %v380_v10, 4 }
 0x4e8   :  { %v373_v13 = vrot.slane %v372_v11, 2  ;;  %v382_v14 = vadd.f32 %v381_v12, %v380_v10 }
 0x4ea   :  { %v374_v15 = vadd.f32 %v373_v13, %v372_v11  ;;  %v383_v16 = vrot.slane %v382_v14, 2 }
 0x4ec   :  { %v375_v17 = vrot.slane %v374_v15, 1  ;;  %v384_v18 = vadd.f32 %v383_v16, %v382_v14 }
 0x4ee   :  { %v376_v19 = vadd.f32 %v375_v17, %v374_v15  ;;  %v385_v21 = vrot.slane %v384_v18, 1 }
 0x4f0   :  { %v378_v22 = vmul.f32 0.125, %v376_v19  ;;  %v386_v23 = vadd.f32 %v385_v21, %v384_v18 }
 0x4f2   :  { %v387_v24 = vmul.f32 0.125, %v386_v23  ;;  %v388_v25 = vmul.f32 %v378_v22, %v378_v22  ;;  %v394_v35 = vsub.f32 %v369_v6, %v378_v22 }
 0x4f4   :  { %v389_v26 = vsub.f32 %v387_v24, %v388_v25 }
 0x4f6   :  { %v390_v27 = vmax.f32 %v389_v26, 0.0 }
 0x4f8   :  { %v391_v28 = vadd.f32 1e-05, %v390_v27 }
 0x4fa   :  { %890 = vrsqrt.f32 %v391_v28 }
 0x504   :  { %v891_v33 = vpop.eup %890 }
 0x505   :  { %v393_v34 = vmul.f32 %v891_v33, %v70_v31 }
 0x507   :  { %v399_v36 = vrot.slane %v393_v34, %v398_v32 }
 0x509   :  { %v401_v38 = vmul.f32 %v399_v36, %v394_v35 }
 0x50b   :  { %v408_v39 = vadd.f32 %v777_v37, %v401_v38 }
 0x50d   :  { %v410_v40 = vmul.f32 0.1, %v408_v39  ;;  %vm409_vm7 = vcmp.gt.f32.partialorder %v408_v39, 0.0 }
 0x50f   :  { %v411_v41 = vsel %vm409_vm7, %v408_v39, %v410_v40 }
 0x510   :  { %v417_v42 = vpack.c.bf16 %v411_v41, %v411_v41 }
 0x512   :  { %839 = vmatmul.mubr.msk.bf16.vlgmr.msra.gmra.mrb[8].mxu1 %vm85_vm1, %v417_v42 }
 0x513   :  { %850 = vmatprep.mubr.msk.bf16.mxu1 %vm979_vm0, %v978_v0 }
 0x5e5   :  { %v467_v44 = vpop.f32.mrb[8].mxu1 }
 0x5e6   :  { %v1153_v45 = vadd.f32 %v778_v43, %v467_v44  ;;  %v840_v46 = vpop.f32.mrb[9].mxu1 }
 0x5e7   :  { %v470_v47 = vpop.f32.mrb[10].mxu1 }
 0x5e8   :  { %v475_v48 = vpack.c.bf16 %v1153_v45, %v1153_v45  ;;  %v841_v49 = vpop.f32.mrb[11].mxu1  ;;  %v473_v50 = vmul.f32 0.35355338, %v1153_v45 }
 0x5ea   :  { %591 = vrot.lane.b32.xlu0 %v475_v48, %s982_s21  ;;  %477 = vrot.lane.b32.xlu1 %v475_v48, %s980_s19  ;;  %v474_v51 = vpack.c.bf16 %v473_v50, %v473_v50 }
 0x5ee   :  { %589 = vrot.lane.b32.xlu1 %v474_v51, %s981_s20 }
 0x65c   :  { %v478_v52 = vpop.permute.xlu1 %477  ;;  %v592_v54 = vpop.permute.xlu0 %591 }
 0x65d   :  { %v483_v53 = vsel %vm135_vm2, %v478_v52, 0  ;;  %v597_v55 = vsel %vm135_vm2, %v592_v54, 0 }
 0x65e   :  { %843 = vmatpush3.bf16.xpose.msra.mxu0 %v483_v53 }
 0x65f   :  { %854 = vmatprep.subr.bf16.mxu0 %v978_v0 }
 0x660   :  { %v590_v56 = vpop.permute.xlu1 %589 }
 0x665   :  { %845 = vmatmul.mubr.msk.bf16.vlgmr.msra.gmra.mrb[12].mxu0 %vm135_vm2, %v474_v51 }
 0x666   :  { %855 = vmatpush3.bf16.xpose.msra.mxu0 %v597_v55  ;;  %856 = vmatprep.mubr.msk.bf16.mxu0 %vm979_vm0, %v978_v0 }
 0x66d   :  { %857 = vmatmul.mubr.msk.bf16.vlgmr.msra.gmra.mrb[16].mxu0 %vm135_vm2, %v590_v56 }
 0x738   :  { %v519_v57 = vpop.f32.mrb[12].mxu0 }
 0x739   :  { %v525_v58 = vsel %vm1103_vm3, %v519_v57, -1e+30  ;;  %v846_v59 = vpop.f32.mrb[13].mxu0 }
 0x73a   :  { %v522_v60 = vpop.f32.mrb[14].mxu0  ;;  %v526_v61 = vsel %vm135_vm2, %v525_v58, -inf }
 0x73b   :  { %527 = vmax.xlane.f32.xlu0 %v526_v61  ;;  %v847_v62 = vpop.f32.mrb[15].mxu0 }
 0x740   :  { %v633_v63 = vpop.f32.mrb[16].mxu0 }
 0x741   :  { %v639_v1 = vsel %vm1103_vm3, %v633_v63, -1e+30  ;;  %v858_v2 = vpop.f32.mrb[17].mxu0 }
 0x742   :  { %v636_v3 = vpop.f32.mrb[18].mxu0  ;;  %v640_v4 = vsel %vm135_vm2, %v639_v1, -inf }
 0x743   :  { %641 = vmax.xlane.f32.xlu1 %v640_v4  ;;  %v859_v5 = vpop.f32.mrb[19].mxu0 }
 0x754   :  { %540 = vrot.lane.b32.xlu1 %v475_v48, %s983_s1 }
 0x7c8   :  { %v528_v6 = vpop.xlane.xlu0 %527 }
 0x7c9   :  { %v529_v7 = vsub.f32 %v525_v58, %v528_v6  ;;  %vm535_vm8 = vcmp.gt.f32.partialorder %v528_v6, -1e+29  ;;  %v785_v6 = vld [vmem:[%s1221_s9] ss:$0 sm:$0xff] }
 0x7cb   :  { %v530_v8 = vmul.f32 1.442695, %v529_v7 }
 0x7cd   :  { %892 = vpow2.f32 %v530_v8 }
 0x7d0   :  { %v642_v9 = vpop.xlane.xlu1 %641 }
 0x7d1   :  { %v643_v10 = vsub.f32 %v639_v1, %v642_v9  ;;  %vm649_vm9 = vcmp.gt.f32.partialorder %v642_v9, -1e+29  ;;  %v415_v1 = vld [vmem:[%s1220_s8] sm:$0x1]  ;;  %s946_s8 = scalar_lea.vmem %s761_s0, 128 }
 0x7d2   :  { %p947_p2 = scmp.ne.s32.totalorder %s761_s0, %s946_s8  ;;  %p952_p4 = scmp.lt.s32.totalorder %s946_s8, %s946_s8 }
 0x7d3   :  { %v644_v11 = vmul.f32 1.442695, %v643_v10 }
 0x7d4   :  { %v541_v12 = vpop.permute.xlu1 %540  ;;  %p953_p5 = por %p952_p4, %p951_p3 }
 0x7d5   :  { %894 = vpow2.f32 %v644_v11  ;;  %v546_v20 = vsel %vm202_vm4, %v541_v12, 0 }
 0x7d6   :  { %849 = vmatpush3.bf16.msra.mxu1 %v546_v20  ;;  %p954_p6 = pnand %p953_p5, %p947_p2 }
 0x7d7   :  { %v893_v13 = vpop.eup %892  ;;  %860 = vmatprep.subr.bf16.mxu1 %v978_v0 }
 0x7d8   :  { %v532_v14 = vsel %vm135_vm2, %v893_v13, 0.0 }
 0x7d9   :  { %533 = vadd.xlane.f32.xlu0 %v532_v14 }
 0x7df   :  { %v895_v15 = vpop.eup %894 }
 0x7e0   :  { %v646_v16 = vsel %vm135_vm2, %v895_v15, 0.0 }
 0x7e1   :  { %647 = vadd.xlane.f32.xlu0 %v646_v16 }
 0x7f7   :  { %654 = vrot.lane.b32.xlu0 %v475_v48, %s984_s23 }
 0x866   :  { %v534_v17 = vpop.xlane.xlu0 %533 }
 0x867   :  { %896 = vrcp.f32 %v534_v17 }
 0x86e   :  { %v648_v18 = vpop.xlane.xlu0 %647 }
 0x86f   :  { %898 = vrcp.f32 %v648_v18 }
 0x871   :  { %v897_v19 = vpop.eup %896 }
 0x872   :  { %v537_v21 = vsel %vm535_vm8, %v897_v19, 0.0  ;;  %v655_v23 = vpop.permute.xlu0 %654 }
 0x873   :  { %v538_v22 = vmul.f32 %v893_v13, %v537_v21  ;;  %v660_v25 = vsel %vm202_vm4, %v655_v23, 0 }
 0x875   :  { %v539_v24 = vpack.c.bf16 %v538_v22, %v538_v22 }
 0x877   :  { %851 = vmatmul.mubr.msk.bf16.vlgmr.msra.gmra.mrb[12].mxu1 %vm135_vm2, %v539_v24 }
 0x878   :  { %861 = vmatpush3.bf16.msra.mxu1 %v660_v25  ;;  %862 = vmatprep.mubr.msk.bf16.mxu1 %vm979_vm0, %v978_v0 }
 0x879   :  { %v899_v26 = vpop.eup %898 }
 0x87a   :  { %v651_v27 = vsel %vm649_vm9, %v899_v26, 0.0 }
 0x87b   :  { %v652_v28 = vmul.f32 %v895_v15, %v651_v27 }
 0x87d   :  { %v653_v29 = vpack.c.bf16 %v652_v28, %v652_v28 }
 0x87f   :  { %863 = vmatmul.mubr.msk.bf16.vlgmr.msra.gmra.mrb[16].mxu1 %vm135_vm2, %v653_v29 }
 0x94a   :  { %v582_v31 = vpop.f32.mrb[12].mxu1 }
 0x94b   :  { %v852_v33 = vpop.f32.mrb[13].mxu1 }
 0x94c   :  { %v585_v34 = vpop.f32.mrb[14].mxu1 }
 0x94d   :  { %v853_v35 = vpop.f32.mrb[15].mxu1 }
 0x952   :  { %v696_v36 = vpop.f32.mrb[16].mxu1 }
 0x953   :  { %703 = vrot.lane.b32.xlu1 %v696_v36, %s986_s25  ;;  %v864_v37 = vpop.f32.mrb[17].mxu1 }
 0x954   :  { %v699_v38 = vpop.f32.mrb[18].mxu1 }
 0x955   :  { %v865_v39 = vpop.f32.mrb[19].mxu1 }
 0x957   :  { %708 = vrot.lane.b32.xlu1 %v1153_v45, %s985_s24 }
 0x9c5   :  { %v704_v0 = vpop.permute.xlu1 %703 }
 0x9c6   :  { %v706_v40 = vsel %vm135_vm2, %v582_v31, %v704_v0 }
 0x9c9   :  { %v709_v41 = vpop.permute.xlu1 %708 }
 0x9ca   :  { %v711_v42 = vadd.f32 %v709_v41, %v706_v40 }
 0x9cc   :  { %v712_v43 = vsel %vm85_vm1, %v711_v42, 0.0  ;;  %v720_v44 = vmul.f32 %v711_v42, %v711_v42 }
 0x9cd   :  { %v713_v46 = vrot.slane %v712_v43, 4 }
 0x9ce   :  { %v721_v47 = vsel %vm85_vm1, %v720_v44, 0.0 }
 0x9cf   :  { %v714_v48 = vadd.f32 %v713_v46, %v712_v43  ;;  %v722_v49 = vrot.slane %v721_v47, 4 }
 0x9d1   :  { %v715_v50 = vrot.slane %v714_v48, 2  ;;  %v723_v51 = vadd.f32 %v722_v49, %v721_v47 }
 0x9d3   :  { %v716_v52 = vadd.f32 %v715_v50, %v714_v48  ;;  %v724_v53 = vrot.slane %v723_v51, 2 }
 0x9d5   :  { %v717_v54 = vrot.slane %v716_v52, 1  ;;  %v725_v55 = vadd.f32 %v724_v53, %v723_v51 }
 0x9d7   :  { %v718_v45 = vadd.f32 %v717_v54, %v716_v52  ;;  %v726_v56 = vrot.slane %v725_v55, 1 }
 0x9d9   :  { %v719_v57 = vmul.f32 0.125, %v718_v45  ;;  %v727_v58 = vadd.f32 %v726_v56, %v725_v55 }
 0x9db   :  { %v728_v59 = vmul.f32 0.125, %v727_v58  ;;  %v729_v60 = vmul.f32 %v719_v57, %v719_v57  ;;  %v735_v4 = vsub.f32 %v711_v42, %v719_v57 }
 0x9dd   :  { %v730_v61 = vsub.f32 %v728_v59, %v729_v60 }
 0x9df   :  { %v731_v62 = vmax.f32 %v730_v61, 0.0 }
 0x9e1   :  { %v732_v63 = vadd.f32 1e-05, %v731_v62 }
 0x9e3   :  { %900 = vrsqrt.f32 %v732_v63 }
 0x9ed   :  { %v901_v2 = vpop.eup %900 }
 0x9ee   :  { %v734_v3 = vmul.f32 %v901_v2, %v415_v1 }
 0x9f0   :  { %v740_v5 = vrot.slane %v734_v3, %v398_v32 }
 0x9f2   :  { %v742_v7 = vmul.f32 %v740_v5, %v735_v4 }
 0x9f4   :  { %v749_v8 = vadd.f32 %v785_v6, %v742_v7 }
 0x9f6   :  { %vm750_vm10 = vcmp.gt.f32.partialorder %v749_v8, 0.0  ;;  %v751_v9 = vmul.f32 0.1, %v749_v8 }
 0x9f8   :  { %v752_v10 = vsel %vm750_vm10, %v749_v8, %v751_v9 }
 0x9f9   :  { %753 = vst.msk [vmem:[#allocation7] sm:$0xff] %vm85_vm1, %v752_v10 }
 0x9fa   :  { %957 = shalt.err (!%p954_p6)
}
 0x9fb   :  { %s958_s9 = scalar_lea.hbm %s1222_s10, 128 }
 0x9fc   :  { %p959_p7 = scmp.ne.s32.totalorder %s1222_s10, %s958_s9  ;;  %p962_p8 = scmp.lt.u32.totalorder %s958_s9, %s1222_s10 }
 0x9fe   :  { %p964_p9 = pnand %p962_p8, %p959_p7 }
 0xa00   :  { %967 = shalt.err (!%p964_p9)
}
 0xa01   :  { %763 = dma.vmem_to_hbm [thread:$0]  %s761_s0, 128, %s1222_s10, [#allocation4]  }
 0xa02   :  { %972 = dma.done.wait [#allocation4], 128  }
 0xa03   :  { %973 = vsyncadd [#allocation4], 4294967168 }
 0xa04   :  { %767 = vsyncpa [#allocation3], 1 }
 0xa05   :  { %768 = vsyncpa [#allocation6], 1 }
 0xa06   :  { %769 = vsyncpa [#allocation4], 1 }

</bundles_post_ra>
